<compile_context>
chip_gen: v6e
topology: v6e:2x2x1
jax: 0.10.0
libtpu: 0.0.40
codegen_flags: <defaults>
</compile_context>

<pallas_src>
import math

import jax
import jax.numpy as jnp
from jax import lax
from jax.experimental import pallas as pl
from jax.experimental.pallas import tpu as pltpu


def _cdiv(a: int, b: int) -> int:
    return -(-a // b)


def _round_up(x: int, m: int) -> int:
    return _cdiv(x, m) * m


def _pick_tile(dim: int, tile_max: int, align: int):
    """Tile a dim so padding stays below one alignment unit per tile.

    Returns (tile, padded_dim, num_tiles).  When the dim fits in a single tile
    the exact extent is used (full-extent blocks are exempt from the (8,128)
    alignment rule) so no padding is needed.
    """
    n = _cdiv(dim, tile_max)
    if n <= 1:
        return dim, dim, 1
    tile = _round_up(_cdiv(dim, n), align)
    n = _cdiv(dim, tile)
    return tile, n * tile, n


def _make_kernel(has_bias: bool, multi_i: bool):
    """Kernel factory.  x_ref is (c, V, ti) (native path) or (tm, ti) (fallback);
    the in-kernel reshape merges the leading dims (layout-preserving merge) and
    is a no-op for the 2-D fallback."""
    if multi_i:
        def kernel(*refs):
            if has_bias:
                x_ref, w_ref, b_ref, o_ref, acc_ref = refs
            else:
                x_ref, w_ref, o_ref, acc_ref = refs
                b_ref = None
            i = pl.program_id(3)

            @pl.when(i == 0)
            def _():
                acc_ref[...] = jnp.zeros_like(acc_ref)

            xt = x_ref[...].reshape(-1, x_ref.shape[-1])
            # Contract the last dim of both operands: (tm, ti) x (to, ti) -> (tm, to).
            # TODO(synk): on v5e, verify in the bundle dump that this A.B^T orientation
            # does not emit an XLU vxpose of the weight tile; if it does, store the
            # weight as (K, I, O) once at init and contract (((1,),(0,)),((),())).
            acc_ref[...] += lax.dot_general(
                xt, w_ref[...],
                dimension_numbers=(((1,), (1,)), ((), ())),
                preferred_element_type=jnp.float32)

            @pl.when(i == pl.num_programs(3) - 1)
            def _():
                res = acc_ref[...]
                if b_ref is not None:
                    res = res + b_ref[...]
                o_ref[...] = res.reshape(o_ref.shape).astype(o_ref.dtype)
    else:
        def kernel(*refs):
            if has_bias:
                x_ref, w_ref, b_ref, o_ref = refs
            else:
                x_ref, w_ref, o_ref = refs
                b_ref = None
            xt = x_ref[...].reshape(-1, x_ref.shape[-1])
            res = lax.dot_general(
                xt, w_ref[...],
                dimension_numbers=(((1,), (1,)), ((), ())),
                preferred_element_type=jnp.float32)
            if b_ref is not None:
                res = res + b_ref[...]
            o_ref[...] = res.reshape(o_ref.shape).astype(o_ref.dtype)
    return kernel


def klinear_forward(x, weight, bias=None, *, tm_max=512, to_max=512, ti_max=1024,
                    compute_dtype=None):
    """Pallas implementation of kLinear.forward.

    x:      (..., K, V, I)
    weight: (K, O, I)
    bias:   (O,) or None
    returns (..., K, V, O)
    """
    *lead, K, V, I = x.shape
    Kw, O, Iw = weight.shape
    assert K == Kw and I == Iw, "shape mismatch between x and weight"
    B = int(math.prod(lead)) if lead else 1

    out_dtype = x.dtype
    if compute_dtype is not None:
        # Optional bf16 (etc.) MXU operands; accumulation stays f32.
        x = x.astype(compute_dtype)
        weight = weight.astype(compute_dtype)
    itemsize = jnp.dtype(x.dtype).itemsize
    sublane = {4: 8, 2: 16, 1: 32}.get(itemsize, 8)

    # --- tile selection (padding < one alignment unit per tile) ---
    ti, Ip, n_i = _pick_tile(I, ti_max, 128)
    to, Op, n_o = _pick_tile(O, to_max, 128)
    multi_i = n_i > 1
    has_bias = bias is not None

    # Weight is only padded when O / I actually span multiple tiles.
    wp = weight
    if (Op, Ip) != (O, I):
        # TODO(synk): pre-pad the weight once at parameter-init time (it is a static
        # parameter) instead of per forward call when O/I exceed one tile.
        wp = jnp.pad(weight, ((0, 0), (0, Op - O), (0, Ip - I)))

    b2d = None
    if has_bias:
        b2d = bias.astype(jnp.float32).reshape(1, O)  # added to f32 acc pre-downcast
        if Op != O:
            b2d = jnp.pad(b2d, ((0, 0), (0, Op - O)))

    kernel = _make_kernel(has_bias, multi_i)

    use_native = (V % sublane == 0) and (V <= tm_max)
    if use_native:
        # Primary path: no wrapper-side transpose of x or the output.
        # Block x as (c batches, squeezed K, full V, ti); tm = c * V rows per MXU call.
        c = 1
        for d in range(min(B, max(tm_max // V, 1)), 0, -1):
            if B % d == 0:
                c = d
                break
        tm = c * V
        n_m = B // c
        x_in = x.reshape(B, K, V, I)                      # free reshape
        if Ip != I:
            x_in = jnp.pad(x_in, ((0, 0), (0, 0), (0, 0), (0, Ip - I)))

        if multi_i:
            grid = (n_m, K, n_o, n_i)
            sems = ("parallel", "parallel", "parallel", "arbitrary")
            x_spec = pl.BlockSpec((c, None, V, ti), lambda m, k, o, i: (m, k, 0, i))
            w_spec = pl.BlockSpec((None, to, ti), lambda m, k, o, i: (k, o, i))
            b_spec = pl.BlockSpec((1, to), lambda m, k, o, i: (0, o))
            o_spec = pl.BlockSpec((c, None, V, to), lambda m, k, o, i: (m, k, 0, o))
            scratch = [pltpu.VMEM((tm, to), jnp.float32)]
        else:
            grid = (n_m, K, n_o)
            sems = ("parallel", "parallel", "parallel")
            x_spec = pl.BlockSpec((c, None, V, ti), lambda m, k, o: (m, k, 0, 0))
            w_spec = pl.BlockSpec((None, to, ti), lambda m, k, o: (k, o, 0))
            b_spec = pl.BlockSpec((1, to), lambda m, k, o: (0, o))
            o_spec = pl.BlockSpec((c, None, V, to), lambda m, k, o: (m, k, 0, o))
            scratch = []

        out_shape = jax.ShapeDtypeStruct((B, K, V, Op), out_dtype)
        operands = [x_in, wp] + ([b2d] if has_bias else [])
    else:
        # Fallback (V not a sublane multiple or larger than tm_max): collapse
        # (..., V) into a K-leading (K, M, I) operand (one transpose of x / out in XLA).
        M = B * V
        tm, Mp, n_m = _pick_tile(M, tm_max, sublane)
        xk = x.reshape(B, K, V, I).transpose(1, 0, 2, 3).reshape(K, M, I)
        if (Mp, Ip) != (M, I):
            xk = jnp.pad(xk, ((0, 0), (0, Mp - M), (0, Ip - I)))

        if multi_i:
            grid = (n_m, K, n_o, n_i)
            sems = ("parallel", "parallel", "parallel", "arbitrary")
            x_spec = pl.BlockSpec((None, tm, ti), lambda m, k, o, i: (k, m, i))
            w_spec = pl.BlockSpec((None, to, ti), lambda m, k, o, i: (k, o, i))
            b_spec = pl.BlockSpec((1, to), lambda m, k, o, i: (0, o))
            o_spec = pl.BlockSpec((None, tm, to), lambda m, k, o, i: (k, m, o))
            scratch = [pltpu.VMEM((tm, to), jnp.float32)]
        else:
            grid = (n_m, K, n_o)
            sems = ("parallel", "parallel", "parallel")
            x_spec = pl.BlockSpec((None, tm, ti), lambda m, k, o: (k, m, 0))
            w_spec = pl.BlockSpec((None, to, ti), lambda m, k, o: (k, o, 0))
            b_spec = pl.BlockSpec((1, to), lambda m, k, o: (0, o))
            o_spec = pl.BlockSpec((None, tm, to), lambda m, k, o: (k, m, o))
            scratch = []

        out_shape = jax.ShapeDtypeStruct((K, Mp, Op), out_dtype)
        operands = [xk, wp] + ([b2d] if has_bias else [])

    in_specs = [x_spec, w_spec] + ([b_spec] if has_bias else [])

    # VMEM estimate (double-buffered ins/outs + accumulator) -> explicit limit,
    # kept within the v7x 64 MiB physical budget.
    out_itemsize = jnp.dtype(out_dtype).itemsize
    vmem_est = (2 * (tm * ti * itemsize + to * ti * itemsize + tm * to * out_itemsize
                     + (to * 4 if has_bias else 0))
                + (tm * to * 4 if multi_i else 0))
    vmem_limit = int(min(max(2 * vmem_est, 32 << 20), 64 << 20))

    cost = pl.CostEstimate(
        flops=2 * B * K * V * O * I,
        transcendentals=0,
        bytes_accessed=(B * K * V * I * itemsize + K * O * I * itemsize
                        + (O * 4 if has_bias else 0)
                        + B * K * V * O * out_itemsize))

    out = pl.pallas_call(
        kernel,
        out_shape=out_shape,
        grid_spec=pltpu.PrefetchScalarGridSpec(
            num_scalar_prefetch=0,
            grid=grid,
            in_specs=in_specs,
            out_specs=o_spec,
            scratch_shapes=scratch),
        compiler_params=pltpu.CompilerParams(
            dimension_semantics=sems,
            vmem_limit_bytes=vmem_limit),
        cost_estimate=cost,
    )(*operands)

    if use_native:
        if Op != O:
            out = out[..., :O]
        return out.reshape(*lead, K, V, O) if lead else out.reshape(K, V, O)
    else:
        out = out[:, :B * V, :O].reshape(K, B, V, O).transpose(1, 0, 2, 3)
        return out.reshape(*lead, K, V, O) if lead else out.reshape(K, V, O)


def init_params(key, in_size, out_size, k, dtype=jnp.float32, with_bias=True):
    """Deterministic kaiming_uniform(a=sqrt(5))-style init matching kLinear shapes."""
    kw, kb = jax.random.split(key)
    fan_in = out_size * in_size  # torch fan_in for a (k, out, in) tensor
    bound = 1.0 / math.sqrt(fan_in)
    weight = jax.random.uniform(kw, (k, out_size, in_size), dtype=dtype,
                                minval=-bound, maxval=bound)
    bias = None
    if with_bias:
        bias = jax.random.uniform(kb, (out_size,), dtype=dtype,
                                  minval=-bound, maxval=bound)
    return weight, bias


if __name__ == "__main__":
    key = jax.random.PRNGKey(0)
    kx1, kp1, kx2, kp2, kx3, kp3, kx4 = jax.random.split(key, 7)

    # Case 1: small, single-tile, with bias -> native (no-transpose) path, no scratch.
    B, K, V, I, O = 2, 2, 8, 32, 16
    x1 = jax.random.normal(kx1, (B, K, V, I), dtype=jnp.float32)
    w1, b1 = init_params(kp1, I, O, K, with_bias=True)
    out1 = jax.block_until_ready(klinear_forward(x1, w1, b1))
    ref1 = jnp.einsum('...kvi,koi->...kvo', x1, w1) + b1
    assert out1.shape == (B, K, V, O)
    assert jnp.allclose(out1, ref1, atol=2e-3, rtol=2e-3)

    # Case 2: forces multiple O and I tiles (tail padding + f32 accumulator path), no bias.
    B2, K2, V2, I2, O2 = 2, 3, 8, 272, 144
    x2 = jax.random.normal(kx2, (B2, K2, V2, I2), dtype=jnp.float32)
    w2, _ = init_params(kp2, I2, O2, K2, with_bias=False)
    out2 = jax.block_until_ready(
        klinear_forward(x2, w2, None, to_max=128, ti_max=128))
    ref2 = jnp.einsum('...kvi,koi->...kvo', x2, w2)
    assert out2.shape == (B2, K2, V2, O2)
    assert jnp.allclose(out2, ref2, atol=2e-3, rtol=2e-3)

    # Case 3: V not a sublane multiple -> fallback (collapsed / transposed) path, with bias.
    B3, K3, V3, I3, O3 = 2, 2, 5, 32, 16
    x3 = jax.random.normal(kx3, (B3, K3, V3, I3), dtype=jnp.float32)
    w3, b3 = init_params(kp3, I3, O3, K3, with_bias=True)
    out3 = jax.block_until_ready(klinear_forward(x3, w3, b3))
    ref3 = jnp.einsum('...kvi,koi->...kvo', x3, w3) + b3
    assert out3.shape == (B3, K3, V3, O3)
    assert jnp.allclose(out3, ref3, atol=2e-3, rtol=2e-3)

    # Case 4: no leading batch dims (x is (K, V, I)).
    x_nolead = jax.random.normal(kx4, (K, V, I), dtype=jnp.float32)
    out4 = jax.block_until_ready(klinear_forward(x_nolead, w1, b1))
    ref4 = jnp.einsum('kvi,koi->kvo', x_nolead, w1) + b1
    assert out4.shape == (K, V, O)
    assert jnp.allclose(out4, ref4, atol=2e-3, rtol=2e-3)

    print("KERNEL_OK")
</pallas_src>

<mosaic_0001>
module attributes {stable_mosaic.version = 11 : i64} {
  func.func @kernel(%arg0: i32, %arg1: i32, %arg2: i32, %arg3: memref<2x1x8x32xf32, #tpu.memory_space<vmem>>, %arg4: memref<1x16x32xf32, #tpu.memory_space<vmem>>, %arg5: memref<1x16xf32, #tpu.memory_space<vmem>>, %arg6: memref<2x1x8x16xf32, #tpu.memory_space<vmem>>) attributes {dimension_semantics = [#tpu.dimension_semantics<parallel>, #tpu.dimension_semantics<parallel>, #tpu.dimension_semantics<parallel>], iteration_bounds = array<i64: 1, 2, 1>, scalar_prefetch = 0 : i64, scratch_operands = 0 : i64, tpu.core_type = #tpu.core_type<tc>, window_params = [{transform_indices = @transform_0, window_bounds = array<i64: 2, 1, 8, 32>}, {transform_indices = @transform_1, window_bounds = array<i64: 1, 16, 32>}, {transform_indices = @transform_2, window_bounds = array<i64: 1, 16>}, {transform_indices = @transform_3, window_bounds = array<i64: 2, 1, 8, 16>}]} {
    %c0 = arith.constant 0 : index
    %c0_0 = arith.constant 0 : index
    %c0_1 = arith.constant 0 : index
    %c0_2 = arith.constant 0 : index
    %0 = vector.load %arg3[%c0, %c0_0, %c0_1, %c0_2] : memref<2x1x8x32xf32, #tpu.memory_space<vmem>>, vector<2x1x8x32xf32>
    %1 = vector.shape_cast %0 : vector<2x1x8x32xf32> to vector<2x8x32xf32>
    %2 = vector.shape_cast %1 : vector<2x8x32xf32> to vector<16x32xf32>
    %c0_3 = arith.constant 0 : index
    %c0_4 = arith.constant 0 : index
    %c0_5 = arith.constant 0 : index
    %3 = vector.load %arg4[%c0_3, %c0_4, %c0_5] : memref<1x16x32xf32, #tpu.memory_space<vmem>>, vector<1x16x32xf32>
    %4 = vector.shape_cast %3 : vector<1x16x32xf32> to vector<16x32xf32>
    %cst = arith.constant dense<0.000000e+00> : vector<16x16xf32>
    %5 = tpu.matmul %2, %4, %cst {dimension_numbers = #tpu.dot_dimension_numbers<[1], [1], [0], [0], [0, 0, 1, 0], [], []>} : vector<16x32xf32>, vector<16x32xf32>, vector<16x16xf32> -> vector<16x16xf32>
    %c0_6 = arith.constant 0 : index
    %c0_7 = arith.constant 0 : index
    %6 = vector.load %arg5[%c0_6, %c0_7] : memref<1x16xf32, #tpu.memory_space<vmem>>, vector<1x16xf32>
    %7 = vector.broadcast %6 : vector<1x16xf32> to vector<16x16xf32>
    %8 = arith.addf %5, %7 : vector<16x16xf32>
    %9 = vector.shape_cast %8 : vector<16x16xf32> to vector<2x8x16xf32>
    %c0_8 = arith.constant 0 : index
    %c0_9 = arith.constant 0 : index
    %c0_10 = arith.constant 0 : index
    %c0_11 = arith.constant 0 : index
    %10 = vector.load %arg6[%c0_8, %c0_9, %c0_10, %c0_11] : memref<2x1x8x16xf32, #tpu.memory_space<vmem>>, vector<2x1x8x16xf32>
    %11 = vector.shape_cast %10 : vector<2x1x8x16xf32> to vector<2x8x16xf32>
    %12 = vector.shape_cast %9 : vector<2x8x16xf32> to vector<2x1x8x16xf32>
    tpu.vector_store %arg6[%c0_8, %c0_9, %c0_10, %c0_11], %12 {strides = array<i32>} : memref<2x1x8x16xf32, #tpu.memory_space<vmem>>, vector<2x1x8x16xf32>,
    return
  }
  func.func @transform_0(%arg0: i32, %arg1: i32, %arg2: i32) -> (i32, i32, i32, i32) {
    %c0_i32 = arith.constant 0 : i32
    %c0_i32_0 = arith.constant 0 : i32
    %c0_i32_1 = arith.constant 0 : i32
    return %arg0, %arg1, %c0_i32, %c0_i32_0 : i32, i32, i32, i32
  }
  func.func @transform_1(%arg0: i32, %arg1: i32, %arg2: i32) -> (i32, i32, i32) {
    %c0_i32 = arith.constant 0 : i32
    %c0_i32_0 = arith.constant 0 : i32
    return %arg1, %arg2, %c0_i32 : i32, i32, i32
  }
  func.func @transform_2(%arg0: i32, %arg1: i32, %arg2: i32) -> (i32, i32) {
    %c0_i32 = arith.constant 0 : i32
    %c0_i32_0 = arith.constant 0 : i32
    return %c0_i32, %arg2 : i32, i32
  }
  func.func @transform_3(%arg0: i32, %arg1: i32, %arg2: i32) -> (i32, i32, i32, i32) {
    %c0_i32 = arith.constant 0 : i32
    %c0_i32_0 = arith.constant 0 : i32
    return %arg0, %arg1, %c0_i32, %arg2 : i32, i32, i32, i32
  }
}

</mosaic_0001>

<bundles_post_ra>
// kernel: tpu_custom_call.1
= control target key start
LH: loop header
LB: loop body
LE: loop exit
PB: predicated region body
PF: predicated region fallthrough
CT: control target
= control target key end

     0   :  { %s981_s0 = inlined_call_operand.hbm [shape: f32[2,2,8,32], index: 0, kind: input, shape index: {}]   ;;  %s982_s1 = inlined_call_operand.hbm [shape: f32[2,16,32], index: 1, kind: input, shape index: {}]   ;;  %s983_s2 = inlined_call_operand.vmem [shape: f32[1,16], index: 2, kind: input, shape index: {}]   ;;  %s984_s3 = inlined_call_operand.hbm [shape: f32[2,2,8,16], index: 3, kind: output, shape index: {}]  }
   0x1   :  { %986 = sst [smem:[#allocation12_spill]] %s981_s0 }
   0x2   :  { %8 = vsyncpa [#allocation3], 0 }
   0x3   :  { %10 = vsyncpa [#allocation3 + $0x1], 0 }
   0x4   :  { %11 = vsyncpa [#allocation6], 0 }
   0x5   :  { %13 = vsyncpa [#allocation6 + $0x1], 0 }
   0x6   :  { %14 = vsyncpa [#allocation4], 0 }
   0x7   :  { %16 = vsyncpa [#allocation4 + $0x1], 0  ;;  %s802_s12 = smov 0   ;;  %s804_s13 = smov 0  }
   0x8   :  { %s806_s14 = smov 0   ;;  %s808_s15 = smov 0  }
   0x9   :  { %s810_s16 = smov 0   ;;  %s812_s17 = smov 0  }
   0xa LB: > { %s523_s18 = sadd.s32 4294967295, %s771_s17   ;;  %s524_s19 = sadd.s32 4294967294, %s771_s17   ;;  %s771_s17 = sphi %s812_s17, %s22_s17   ;;  %s767_s16 = sphi %s810_s16, %s1000_s16   ;;  %s763_s15 = sphi %s808_s15, %s999_s15   ;;  %s759_s14 = sphi %s806_s14, %s998_s14   ;;  %s755_s13 = sphi %s804_s13, %s997_s13   ;;  %s751_s12 = sphi %s802_s12, %s996_s12  }
   0xb   : > { %s37_s20 = sadd.s32 1, %s767_s16  ;;  %s50_s21 = sadd.s32 1, %s759_s14 }
   0xc   : > { %p39_p0 = scmp.ge.s32.totalorder %s37_s20, 2  ;;  %p57_p1 = scmp.ne.s32.totalorder %s759_s14, %s755_s13 }
   0xd   : > { %p58_p2 = scmp.eq.s32.totalorder %s771_s17, 0  ;;  %p63_p3 = scmp.ne.s32.totalorder %s755_s13, %s751_s12 }
   0xe   : > { %s1002_s20 = smov (%p39_p0, %s37_s20), 0  ;;  %p64_p5 = scmp.eq.s32.totalorder %s523_s18, 0 }
   0xf   : > { %987 = sst [smem:[#allocation11_spill]] %s1002_s20  ;;  %p843_p4 = por %p58_p2, %p57_p1 }
  0x10   : > { %s46_s23 = ssub.s32 %s767_s16, %s1002_s20  ;;  %p145_p6 = scmp.eq.s32.totalorder %s523_s18, 1 }
  0x11   : > { %p48_p7 = scmp.eq.s32.totalorder %s46_s23, 0  ;;  %p849_p8 = por %p64_p5, %p63_p3 }
  0x12   : > { %p853_p9 = por %p145_p6, %p57_p1  ;;  %p151_p10 = scmp.eq.s32.totalorder %s524_s19, 1 }
  0x13   : > { %s858_s26 = scalar_select %p48_p7, %s759_s14, %s50_s21  }
  0x14   : > { %p860_p11 = por %p151_p10, %p63_p3  ;;  %p527_p12 = scmp.ge.s32.totalorder %s771_s17, 2 }
  0x15   : > { %p575_p13 = scmp.lt.s32.totalorder %s771_s17, 2  ;;  %s867_s28 = sand.u32 1, %s759_s14  }
  0x16   : > { %s528_s29 = sshll.u32 %s867_s28, 4  ;;  %s529_s30 = sshll.u32 %s767_s16, 7 }
  0x17   : > { %s992_s0 = sld [smem:[#allocation12_spill]]  ;;  %s181_s7 = scalar_lea.vmem [#allocation2], %s528_s29 }
  0x18   : > { %s190_s8 = sshll.u32 %s181_s7, 4  ;;  %p878_p0 = pnand %p575_p13, %p843_p4  ;;  %s191_s8 = int_to_ptr.vmem [resolvable:$true] %s190_s8 }
  0x19   : > { %s178_s10 = scalar_lea.sflag [#allocation3], %s867_s28  ;;  %s644_s11 = scalar_lea.vmem %s191_s8, 256 }
  0x1a   : > { %p633_p1 = pneg %p878_p0  ;;  %p645_p2 = scmp.ne.s32.totalorder %s191_s8, %s644_s11 }
  0x1b   : > { %s773_s18 = smov [#allocation2]  }
  0x1c   : > { %p647_p3 = pnand %p645_p2, %p633_p1  ;;  %s649_s19 = sshll.u32 %s773_s18, 4  ;;  %s650_s19 = int_to_ptr.vmem [resolvable:$false] %s649_s19 }
  0x1d   : > { %s189_s6 = scalar_lea.hbm %s992_s0, %s529_s30  ;;  %s651_s21 = scalar_lea.vmem %s650_s19, 512 }
  0x1e   : > { %p648_p5 = pneg %p647_p3  ;;  %p652_p6 = scmp.lt.s32.totalorder %s191_s8, %s650_s19 }
  0x1f   : > { %p653_p4 = scmp.lt.s32.totalorder %s651_s21, %s644_s11 }
  0x21   : > { %p654_p7 = por %p653_p4, %p652_p6 }
  0x23   : > { %p655_p10 = pnand %p654_p7, %p648_p5 }
  0x25   : > { %658 = shalt.err (!%p655_p10)
}
  0x26   : > { %s774_s22 = smov 256   ;;  %s775_s23 = smov 128  }
  0x27   : > { %s776_s30 = smov 8   ;;  %p533_p13 = scmp.ge.s32.totalorder %s771_s17, 1 }
  0x28   : > { %567 = dma.hbm_to_vmem [thread:$0]  (!%p878_p0), %s189_s6, 256, %s191_s8, %s178_s10, %s774_s22, %s775_s23, %s776_s30  }
  0x29   : > { %p221_p2 = scmp.lt.s32.totalorder %s771_s17, 3  ;;  %s546_s5 = sshll.u32 %s767_s16, 8 }
  0x2a   : > { %s212_s18 = scalar_lea.hbm %s982_s1, %s546_s5  ;;  %s204_s19 = scalar_lea.vmem [#allocation5], %s528_s29 }
  0x2b   : > { %p892_p3 = pnand %p533_p13, %p221_p2  ;;  %s213_s21 = sshll.u32 %s204_s19, 4  ;;  %s214_s21 = int_to_ptr.vmem [resolvable:$true] %s213_s21 }
  0x2c   : > { %s201_s0 = scalar_lea.sflag [#allocation6], %s867_s28  ;;  %s672_s20 = scalar_lea.vmem %s214_s21, 256 }
  0x2d   : > { %p673_p5 = scmp.ne.s32.totalorder %s214_s21, %s672_s20  ;;  %s777_s6 = smov [#allocation5]  }
  0x2e   : > { %s677_s8 = sshll.u32 %s777_s6, 4  ;;  %s678_s8 = int_to_ptr.vmem [resolvable:$false] %s677_s8 }
  0x2f   : > { %p675_p6 = pnand %p673_p5, %p633_p1  ;;  %s679_s10 = scalar_lea.vmem %s678_s8, 512 }
  0x30   : > { %p680_p7 = scmp.lt.s32.totalorder %s214_s21, %s678_s8  ;;  %p681_p10 = scmp.lt.s32.totalorder %s679_s10, %s672_s20 }
  0x31   : > { %p676_p4 = pneg %p675_p6 }
  0x32   : > { %p682_p13 = por %p681_p10, %p680_p7 }
  0x34   : > { %p683_p2 = pnand %p682_p13, %p676_p4 }
  0x36   : > { %686 = shalt.err (!%p683_p2)
}
  0x37   : > { %570 = dma.hbm_to_vmem [thread:$0]  (!%p878_p0), %s212_s18, 256, %s214_s21, %s201_s0, %s775_s23, %s775_s23, %s776_s30  }
  0x38   : > { %225 = sbr.rel (%p892_p3) target bundleno = 285 (0x11d), region = 32  ;;  %s911_s28 = sand.u32 (!%p892_p3), 1, %s755_s13  }
  0x39   : > { %s534_s29 = sshll.u32 (!%p892_p3), %s911_s28, 4  ;;  %s228_s22 = scalar_lea.sflag (!%p892_p3), [#allocation3], %s911_s28 }
  0x3a   : > { %s231_s5 = scalar_lea.vmem (!%p892_p3), [#allocation2], %s534_s29 }
  0x3d   : > { %738 = dma.done.wait (%p849_p8), %s228_s22, 256  }
  0x3e   : > { %740 = vsyncadd (%p849_p8), %s228_s22, 4294967040  ;;  %s237_s0 = scalar_lea.sflag [#allocation6], %s911_s28  ;;  %s240_s20 = scalar_lea.vmem [#allocation5], %s534_s29 }
  0x3f   : > { %742 = dma.done.wait (%p849_p8), %s237_s0, 256  }
  0x40   : > { %744 = vsyncadd (%p849_p8), %s237_s0, 4294967040  ;;  %vm288_vm0 = vcmask 261120   ;;  %v280_v0 = vld [vmem:[%s240_s20 + $0x8] sm:$0xff]  ;;  %v279_v1 = vld [vmem:[%s240_s20] sm:$0xff]  ;;  %s270_s24 = scalar_lea.vmem [#allocation7], %s534_s29  ;;  %s543_s4 = sshll.u32 %s763_s15, 7 }
  0x41   : > { %v277_v2 = vld [vmem:[%s231_s5] sm:$0xff]  ;;  %551 = vmatprep.subr.msk.mxu0 %vm288_vm0, %v280_v0  ;;  %v278_v3 = vld [vmem:[%s231_s5 + $0x8] sm:$0xff]  ;;  %s396_s30 = sshll.u32 %s270_s24, 4  ;;  %vm376_vm1 = vcmask 130048   ;;  %s933_s18 = scalar_lea.hbm %s984_s3, %s543_s4  ;;  %s928_s30 = int_to_ptr.vmem [resolvable:$true] %s396_s30 }
  0x42   : > { %555 = vmatprep.mubr.msk.f32.mxu0 %vm288_vm0, %v277_v2  ;;  %552 = vmatpush3.xpose.msk.msra.mxu0 %vm288_vm0, %v280_v0  ;;  %v537_v4 = vld [vmem:[%s983_s2] ss:$0 sm:$0xff]  ;;  %s380_s19 = scalar_lea.sflag [#allocation4], %s911_s28  ;;  %s687_s21 = scalar_lea.vmem %s928_s30, 256 }
  0x43   : > { %553 = vmatprep.subr.msk.mxu0 %vm288_vm0, %v279_v1  ;;  %p688_p8 = scmp.ne.s32.totalorder %s928_s30, %s687_s21  ;;  %s778_s15 = smov [#allocation7]  }
  0x44   : > { %s691_s6 = sshll.u32 %s778_s15, 4  ;;  %s692_s6 = int_to_ptr.vmem [resolvable:$false] %s691_s6 }
  0x45   : > { %p689_p0 = pnand %p688_p8, %p853_p9  ;;  %s693_s8 = scalar_lea.vmem %s692_s6, 512 }
  0x46   : > { %554 = vmatpush3.xpose.msk.msra.mxu0 %vm288_vm0, %v279_v1  ;;  %p694_p3 = scmp.lt.s32.totalorder %s928_s30, %s692_s6  ;;  %p695_p5 = scmp.lt.s32.totalorder %s693_s8, %s687_s21 }
  0x47   : > { %p690_p1 = pneg %p689_p0 }
  0x48   : > { %p696_p6 = por %p695_p5, %p694_p3 }
  0x49   : > { %556 = vmatmul.mubr.msk.f32.vlgmr.msra.gmra.mxu0 %vm288_vm0, %v278_v3 }
  0x4a   : > { %p697_p4 = pnand %p696_p6, %p690_p1 }
 0x109   : > { %v557_v5 = vpop.f32.mrf.mxu0 }
 0x10a   : > { %v373_v6 = vadd.f32 %v557_v5, %v537_v4 }
 0x10b   : > { %v367_v7 = vpop.f32.mrf.mxu0 }
 0x10c   : > { %378 = vst.msk [vmem:[%s270_s24 + $0x8] sm:$0xff] %vm376_vm1, %v373_v6  ;;  %v368_v8 = vadd.f32 %v537_v4, %v367_v7 }
 0x10e   : > { %377 = vst.msk [vmem:[%s270_s24] sm:$0xff] %vm376_vm1, %v368_v8 }
 0x10f   : > { %700 = shalt.err (!%p697_p4)
}
 0x110   : > { %s701_s10 = scalar_lea.hbm %s933_s18, 256  ;;  %s705_s5 = scalar_lea.hbm %s984_s3, 512 }
 0x111   : > { %p702_p7 = scmp.ne.s32.totalorder %s933_s18, %s701_s10  ;;  %p706_p2 = scmp.lt.s32.totalorder %s933_s18, %s984_s3 }
 0x112   : > { %p707_p8 = scmp.lt.s32.totalorder %s705_s5, %s701_s10 }
 0x113   : > { %p703_p10 = pnand %p702_p7, %p853_p9 }
 0x114   : > { %p708_p0 = por %p707_p8, %p706_p2 }
 0x115   : > { %p704_p13 = pneg %p703_p10 }
 0x117   : > { %p709_p1 = pnand %p708_p0, %p704_p13 }
 0x119   : > { %712 = shalt.err (!%p709_p1)
}
 0x11a   : > { %s779_s9 = smov 128   ;;  %s780_s23 = smov 256  }
 0x11b   : > { %s781_s24 = smov 8  }
 0x11c   : > { %562 = dma.vmem_to_hbm [thread:$0]  (%p853_p9), %s928_s30, 256, %s933_s18, %s380_s19, %s779_s9, %s780_s23, %s781_s24  }
 0x11d PF: > { %s411_s4 = sand.u32 1, %s751_s12   ;;  %p572_p3 = pnand %p527_p12, %p860_p11 }
 0x11e   : > { %s412_s7 = scalar_lea.sflag [#allocation4], %s411_s4 }
 0x11f   : > { %p573_p5 = pneg %p572_p3 }
 0x121   : > { %746 = dma.done.wait (%p573_p5), %s412_s7, 256  }
 0x122   : > { %748 = vsyncadd (%p573_p5), %s412_s7, 4294967040  ;;  %s22_s17 = sadd.s32 1, %s771_s17   ;;  %s995_s25 = sld [smem:[#allocation11_spill]] }
 0x123   : > { %p19_p6 = scmp.ge.s32.totalorder %s22_s17, 4   ;;  %s996_s12 = smov %s755_s13 }
 0x124   : > { %s997_s13 = smov %s759_s14  ;;  %s998_s14 = smov %s858_s26 }
 0x125   : > { %s999_s15 = smov %s767_s16  ;;  %21 = sbr.rel (!%p19_p6) target bundleno = 10 (0xa), region = 93 }
 0x128   : > { %s1000_s16 = smov %s995_s25 }
 0x12a   :  { %417 = vsyncpa [#allocation3], 1 }
 0x12b   :  { %419 = vsyncpa [#allocation3 + $0x1], 1 }
 0x12c   :  { %420 = vsyncpa [#allocation6], 1 }
 0x12d   :  { %422 = vsyncpa [#allocation6 + $0x1], 1 }
 0x12e   :  { %423 = vsyncpa [#allocation4], 1 }
 0x12f   :  { %425 = vsyncpa [#allocation4 + $0x1], 1 }

</bundles_post_ra>
